<compile_context>
chip_gen: v7x
topology: tpu7x:2x2x1
jax: 0.10.0
libtpu: 0.0.40
codegen_flags: <defaults>
</compile_context>

<pallas_src>
import functools

import jax
import jax.numpy as jnp
from jax import lax
from jax.experimental import pallas as pl
from jax.experimental.pallas import tpu as pltpu


def _round_up(x, m):
    return (x + m - 1) // m * m


def _mlp_kernel(x_ref, w_ref, b_ref, o_ref, acc_ref, *, activation, negative_slope):
    # x_ref  : (TM, TK)  row/reduction tile of the input
    # w_ref  : (TN, TK)  weight tile in native (n_out, n_in) layout
    # b_ref  : (1, TN)   bias tile (f32)
    # o_ref  : (TM, TN)  output tile
    # acc_ref: (TM, TN)  f32 accumulator, resident across the K grid axis
    k = pl.program_id(2)

    @pl.when(k == 0)
    def _():
        acc_ref[...] = jnp.zeros_like(acc_ref)

    # Contract x (TM, TK) against w (TN, TK) along the K axis (MXU handles the
    # transposed operand natively; no materialized transpose needed).
    acc_ref[...] += lax.dot_general(
        x_ref[...], w_ref[...],
        dimension_numbers=(((1,), (1,)), ((), ())),
        preferred_element_type=jnp.float32)

    @pl.when(k == pl.num_programs(2) - 1)
    def _():
        y = acc_ref[...] + b_ref[...]                     # f32 epilogue
        if activation:
            y = jnp.maximum(y, negative_slope * y)        # LeakyReLU: vmul + vmax
        o_ref[...] = y.astype(o_ref.dtype)


def shared_dropout_mlp(x, weight, bias, *, tm=256, tn=256, tk=512,
                       activation=True, negative_slope=0.1,
                       compute_dtype=None):
    """Forward of SharedDropoutMLP (p=0 / eval: dropout is identity).

    x:       [..., n_in]
    weight:  [n_out, n_in]  (PyTorch nn.Linear layout, NOT pre-transposed)
    bias:    [n_out]
    compute_dtype: optional dtype (e.g. jnp.bfloat16) for x / weight on the MXU;
                   accumulation, bias add and LeakyReLU stay in f32.
    """
    *lead, n_in = x.shape
    n_out, n_in_w = weight.shape
    assert n_in == n_in_w, "weight must be (n_out, n_in)"
    out_dtype = x.dtype

    M = 1
    for d in lead:
        M *= d

    x2d = x.reshape(M, n_in)
    if compute_dtype is not None:
        x2d = x2d.astype(compute_dtype)
        weight = weight.astype(compute_dtype)
    b2d = bias.astype(jnp.float32).reshape(1, n_out)

    # Hardware-aligned effective tile sizes, clamped for small problems.
    tm_eff = min(tm, _round_up(M, 8))
    tn_eff = min(tn, _round_up(n_out, 128))
    tk_eff = min(tk, _round_up(n_in, 128))

    Mp = _round_up(M, tm_eff)
    Np = _round_up(n_out, tn_eff)
    Kp = _round_up(n_in, tk_eff)

    # Zero-pad to tile multiples (zeros are exact no-ops through matmul/bias/LeakyReLU;
    # padded rows/cols are sliced away below).
    if (Mp, Kp) != (M, n_in):
        x2d = jnp.pad(x2d, ((0, Mp - M), (0, Kp - n_in)))
    if (Np, Kp) != (n_out, n_in):
        weight = jnp.pad(weight, ((0, Np - n_out), (0, Kp - n_in)))
    if Np != n_out:
        b2d = jnp.pad(b2d, ((0, 0), (0, Np - n_out)))

    in_size = jnp.dtype(x2d.dtype).itemsize
    out_size = jnp.dtype(out_dtype).itemsize
    # Double-buffered x / w / bias / out tiles + resident f32 accumulator.
    vmem_bytes = (2 * tm_eff * tk_eff * in_size
                  + 2 * tn_eff * tk_eff * in_size
                  + 2 * tn_eff * 4
                  + 2 * tm_eff * tn_eff * out_size
                  + tm_eff * tn_eff * 4)
    vmem_limit = min(int(vmem_bytes * 1.5) + (4 << 20), 100 << 20)

    kernel = functools.partial(_mlp_kernel, activation=activation,
                               negative_slope=negative_slope)

    out2d = pl.pallas_call(
        kernel,
        out_shape=jax.ShapeDtypeStruct((Mp, Np), out_dtype),
        grid_spec=pltpu.PrefetchScalarGridSpec(
            num_scalar_prefetch=0,
            grid=(Mp // tm_eff, Np // tn_eff, Kp // tk_eff),
            in_specs=[
                pl.BlockSpec((tm_eff, tk_eff), lambda i, j, k: (i, k)),
                pl.BlockSpec((tn_eff, tk_eff), lambda i, j, k: (j, k)),
                pl.BlockSpec((1, tn_eff), lambda i, j, k: (0, j)),
            ],
            out_specs=pl.BlockSpec((tm_eff, tn_eff), lambda i, j, k: (i, j)),
            scratch_shapes=[pltpu.VMEM((tm_eff, tn_eff), jnp.float32)],
        ),
        compiler_params=pltpu.CompilerParams(
            dimension_semantics=("parallel", "parallel", "arbitrary"),
            vmem_limit_bytes=vmem_limit),
    )(x2d, weight, b2d)

    return out2d[:M, :n_out].reshape(*lead, n_out)


if __name__ == "__main__":
    key = jax.random.PRNGKey(0)
    k_x, k_w = jax.random.split(key)

    batch, seq, n_in, n_out = 2, 8, 32, 32

    x = jax.random.normal(k_x, (batch, seq, n_in), dtype=jnp.float32)
    # nn.init.orthogonal_ on the (n_out, n_in) weight; zeros bias.
    weight = jax.nn.initializers.orthogonal()(k_w, (n_out, n_in), jnp.float32)
    bias = jnp.zeros((n_out,), dtype=jnp.float32)

    # Plain-JAX reference.
    ref = x @ weight.T + bias
    ref = jnp.where(ref > 0, ref, 0.1 * ref)

    # f32 path: exact check.
    out = shared_dropout_mlp(x, weight, bias)
    out = jax.block_until_ready(out)
    assert out.shape == (batch, seq, n_out)
    assert jnp.allclose(out, ref, atol=1e-5, rtol=1e-5), "f32 mismatch vs reference"

    # bf16 MXU path (f32 accumulate + epilogue): loose tolerance.
    out_bf16 = shared_dropout_mlp(x, weight, bias, compute_dtype=jnp.bfloat16)
    out_bf16 = jax.block_until_ready(out_bf16)
    assert jnp.allclose(out_bf16, ref, atol=1e-1, rtol=1e-1), "bf16 mismatch vs reference"

    print("KERNEL_OK")
</pallas_src>

<mosaic_0001>
module attributes {stable_mosaic.version = 11 : i64} {
  func.func @_mlp_kernel(%arg0: i32, %arg1: i32, %arg2: i32, %arg3: memref<16x128xf32, #tpu.memory_space<vmem>>, %arg4: memref<128x128xf32, #tpu.memory_space<vmem>>, %arg5: memref<1x128xf32, #tpu.memory_space<vmem>>, %arg6: memref<16x128xf32, #tpu.memory_space<vmem>>, %arg7: memref<16x128xf32, #tpu.memory_space<vmem>>) attributes {dimension_semantics = [#tpu.dimension_semantics<parallel>, #tpu.dimension_semantics<parallel>, #tpu.dimension_semantics<arbitrary>], iteration_bounds = array<i64: 1, 1, 1>, scalar_prefetch = 0 : i64, scratch_operands = 1 : i64, tpu.core_type = #tpu.core_type<tc>, window_params = [{transform_indices = @transform_0, window_bounds = array<i64: 16, 128>}, {transform_indices = @transform_1, window_bounds = array<i64: 128, 128>}, {transform_indices = @transform_2, window_bounds = array<i64: 1, 128>}, {transform_indices = @transform_3, window_bounds = array<i64: 16, 128>}]} {
    %c0_i32 = arith.constant 0 : i32
    %0 = arith.cmpi eq, %arg2, %c0_i32 : i32
    %1 = arith.extui %0 : i1 to i32
    %c0_i32_0 = arith.constant 0 : i32
    %2 = arith.cmpi ne, %1, %c0_i32_0 : i32
    scf.if %2 {
      %cst_10 = arith.constant 0.000000e+00 : f32
      %12 = vector.broadcast %cst_10 : f32 to vector<16x128xf32>
      %c0_11 = arith.constant 0 : index
      %c0_12 = arith.constant 0 : index
      %13 = vector.load %arg7[%c0_11, %c0_12] : memref<16x128xf32, #tpu.memory_space<vmem>>, vector<16x128xf32>
      tpu.vector_store %arg7[%c0_11, %c0_12], %12 {strides = array<i32>} : memref<16x128xf32, #tpu.memory_space<vmem>>, vector<16x128xf32>,
    } else {
    }
    %c0 = arith.constant 0 : index
    %c0_1 = arith.constant 0 : index
    %3 = vector.load %arg7[%c0, %c0_1] : memref<16x128xf32, #tpu.memory_space<vmem>>, vector<16x128xf32>
    %c0_2 = arith.constant 0 : index
    %c0_3 = arith.constant 0 : index
    %4 = vector.load %arg3[%c0_2, %c0_3] : memref<16x128xf32, #tpu.memory_space<vmem>>, vector<16x128xf32>
    %c0_4 = arith.constant 0 : index
    %c0_5 = arith.constant 0 : index
    %5 = vector.load %arg4[%c0_4, %c0_5] : memref<128x128xf32, #tpu.memory_space<vmem>>, vector<128x128xf32>
    %cst = arith.constant dense<0.000000e+00> : vector<16x128xf32>
    %6 = tpu.matmul %4, %5, %cst {dimension_numbers = #tpu.dot_dimension_numbers<[1], [1], [0], [0], [0, 0, 1, 0], [], []>} : vector<16x128xf32>, vector<128x128xf32>, vector<16x128xf32> -> vector<16x128xf32>
    %7 = arith.addf %3, %6 : vector<16x128xf32>
    %c0_6 = arith.constant 0 : index
    %c0_7 = arith.constant 0 : index
    %8 = vector.load %arg7[%c0_6, %c0_7] : memref<16x128xf32, #tpu.memory_space<vmem>>, vector<16x128xf32>
    tpu.vector_store %arg7[%c0_6, %c0_7], %7 {strides = array<i32>} : memref<16x128xf32, #tpu.memory_space<vmem>>, vector<16x128xf32>,
    %c0_i32_8 = arith.constant 0 : i32
    %9 = arith.cmpi eq, %arg2, %c0_i32_8 : i32
    %10 = arith.extui %9 : i1 to i32
    %c0_i32_9 = arith.constant 0 : i32
    %11 = arith.cmpi ne, %10, %c0_i32_9 : i32
    scf.if %11 {
      %c0_10 = arith.constant 0 : index
      %c0_11 = arith.constant 0 : index
      %12 = vector.load %arg7[%c0_10, %c0_11] : memref<16x128xf32, #tpu.memory_space<vmem>>, vector<16x128xf32>
      %c0_12 = arith.constant 0 : index
      %c0_13 = arith.constant 0 : index
      %13 = vector.load %arg5[%c0_12, %c0_13] : memref<1x128xf32, #tpu.memory_space<vmem>>, vector<1x128xf32>
      %14 = vector.broadcast %13 : vector<1x128xf32> to vector<16x128xf32>
      %15 = arith.addf %12, %14 : vector<16x128xf32>
      %cst_14 = arith.constant 1.000000e-01 : f32
      %16 = vector.broadcast %cst_14 : f32 to vector<16x128xf32>
      %17 = arith.mulf %16, %15 : vector<16x128xf32>
      %18 = arith.maximumf %15, %17 : vector<16x128xf32>
      %c0_15 = arith.constant 0 : index
      %c0_16 = arith.constant 0 : index
      %19 = vector.load %arg6[%c0_15, %c0_16] : memref<16x128xf32, #tpu.memory_space<vmem>>, vector<16x128xf32>
      tpu.vector_store %arg6[%c0_15, %c0_16], %18 {strides = array<i32>} : memref<16x128xf32, #tpu.memory_space<vmem>>, vector<16x128xf32>,
    } else {
    }
    return
  }
  func.func @transform_0(%arg0: i32, %arg1: i32, %arg2: i32) -> (i32, i32) {
    %c0_i32 = arith.constant 0 : i32
    return %arg0, %arg2 : i32, i32
  }
  func.func @transform_1(%arg0: i32, %arg1: i32, %arg2: i32) -> (i32, i32) {
    %c0_i32 = arith.constant 0 : i32
    return %arg1, %arg2 : i32, i32
  }
  func.func @transform_2(%arg0: i32, %arg1: i32, %arg2: i32) -> (i32, i32) {
    %c0_i32 = arith.constant 0 : i32
    %c0_i32_0 = arith.constant 0 : i32
    return %c0_i32, %arg1 : i32, i32
  }
  func.func @transform_3(%arg0: i32, %arg1: i32, %arg2: i32) -> (i32, i32) {
    %c0_i32 = arith.constant 0 : i32
    return %arg0, %arg1 : i32, i32
  }
}

</mosaic_0001>

<bundles_post_ra>
// kernel: tpu_custom_call.1
= control target key start
LH: loop header
LB: loop body
LE: loop exit
PB: predicated region body
PF: predicated region fallthrough
CT: control target
= control target key end

     0   :  { %8 = vsyncpa [#allocation4], 0  ;;  %s422_s0 = inlined_call_operand.hbm [shape: f32[16,128], index: 0, kind: input, shape index: {}]   ;;  %s423_s1 = inlined_call_operand.hbm [shape: f32[128,128], index: 1, kind: input, shape index: {}]   ;;  %s424_s2 = inlined_call_operand.vmem [shape: f32[1,128], index: 2, kind: input, shape index: {}]   ;;  %s425_s3 = inlined_call_operand.hbm [shape: f32[16,128], index: 3, kind: output, shape index: {}]  }
   0x1   :  { %9 = vsyncpa [#allocation7], 0 }
   0x2   :  { %10 = vsyncpa [#allocation5], 0  ;;  %s349_s12 = smov [#allocation3]   ;;  %s277_s16 = scalar_lea.hbm %s422_s0, 256 }
   0x3   :  { %s16_s13 = sshll.u32 %s349_s12, 4  ;;  %p278_p0 = scmp.ne.s32.totalorder %s422_s0, %s277_s16  ;;  %s17_s13 = int_to_ptr.vmem [resolvable:$true] %s16_s13 }
   0x4   :  { %p281_p1 = scmp.lt.u32.totalorder %s277_s16, %s422_s0 }
   0x6   :  { %p283_p2 = pnand %p281_p1, %p278_p0 }
   0x8   :  { %286 = shalt.err (!%p283_p2)
}
   0x9   :  { %s287_s21 = scalar_lea.vmem %s17_s13, 256  ;;  %p292_p4 = scmp.lt.s32.totalorder %s17_s13, %s17_s13 }
   0xa   :  { %p288_p3 = scmp.ne.s32.totalorder %s17_s13, %s287_s21  ;;  %p293_p5 = scmp.lt.s32.totalorder %s287_s21, %s287_s21 }
   0xc   :  { %p294_p6 = por %p293_p5, %p292_p4 }
   0xe   :  { %p295_p7 = pnand %p294_p6, %p288_p3 }
  0x10   :  { %298 = shalt.err (!%p295_p7)
}
  0x11   :  { %s350_s22 = smov 128   ;;  %s351_s23 = smov 8  }
  0x12   :  { %22 = dma.hbm_to_vmem [thread:$0]  %s422_s0, 256, %s17_s13, [#allocation4], %s350_s22, %s350_s22, %s351_s23  }
  0x13   :  { %s352_s26 = smov [#allocation6]   ;;  %s299_s30 = scalar_lea.hbm %s423_s1, 2048 }
  0x14   :  { %s28_s27 = sshll.u32 %s352_s26, 4  ;;  %p300_p8 = scmp.ne.s32.totalorder %s423_s1, %s299_s30  ;;  %s29_s27 = int_to_ptr.vmem [resolvable:$true] %s28_s27 }
  0x15   :  { %p303_p9 = scmp.lt.u32.totalorder %s299_s30, %s423_s1 }
  0x17   :  { %p305_p10 = pnand %p303_p9, %p300_p8 }
  0x19   :  { %308 = shalt.err (!%p305_p10)
}
  0x1a   :  { %s309_s8 = scalar_lea.vmem %s29_s27, 2048  ;;  %p314_p12 = scmp.lt.s32.totalorder %s29_s27, %s29_s27 }
  0x1b   :  { %p310_p11 = scmp.ne.s32.totalorder %s29_s27, %s309_s8  ;;  %p315_p13 = scmp.lt.s32.totalorder %s309_s8, %s309_s8 }
  0x1d   :  { %p316_p0 = por %p315_p13, %p314_p12 }
  0x1f   :  { %p317_p1 = pnand %p316_p0, %p310_p11 }
  0x21   :  { %320 = shalt.err (!%p317_p1)
}
  0x22   :  { %34 = dma.hbm_to_vmem [thread:$0]  %s423_s1, 2048, %s29_s27, [#allocation7], %s350_s22, %s350_s22, %s351_s23  }
  0x23   :  { %343 = dma.done.wait [#allocation4], 256  }
  0x24   :  { %344 = vsyncadd [#allocation4], 4294967040 }
  0x25   :  { %345 = dma.done.wait [#allocation7], 2048  }
  0x26   :  { %346 = vsyncadd [#allocation7], 4294965248  ;;  %v53_v0 = vld [vmem:[#allocation6] sm:$0xff]  ;;  %v54_v1 = vld [vmem:[#allocation6 + $0x8] sm:$0xff]  ;;  %s353_s11 = smov [#allocation8]  }
  0x27   :  { %v55_v2 = vld [vmem:[#allocation6 + $0x10] sm:$0xff]  ;;  %v240_v3 = vpack.c.bf16 %v54_v1, %v53_v0  ;;  %v56_v4 = vld [vmem:[#allocation6 + $0x18] sm:$0xff]  ;;  %v57_v7 = vld [vmem:[#allocation6 + $0x20] sm:$0xff]  ;;  %s173_s12 = sshll.u32 %s353_s11, 4  ;;  %s174_s12 = int_to_ptr.vmem [resolvable:$true] %s173_s12 }
  0x28   :  { %v244_v5 = vpack.c.bf16 %v56_v4, %v55_v2  ;;  %v51_v6 = vld [vmem:[#allocation3] sm:$0xff]  ;;  %v58_v8 = vld [vmem:[#allocation6 + $0x28] sm:$0xff]  ;;  %v60_v11 = vld [vmem:[#allocation6 + $0x38] sm:$0xff]  ;;  %s321_s13 = scalar_lea.vmem %s174_s12, 256  ;;  %p326_p3 = scmp.lt.s32.totalorder %s174_s12, %s174_s12 }
  0x29   :  { %241 = vmatprep.subr.bf16.mxu0 %v240_v3  ;;  %237 = vmatprep.mubr.f32.mxu0 %v51_v6  ;;  %v248_v9 = vpack.c.bf16 %v58_v8, %v57_v7  ;;  %v59_v10 = vld [vmem:[#allocation6 + $0x30] sm:$0xff]  ;;  %v61_v13 = vld [vmem:[#allocation6 + $0x40] sm:$0xff]  ;;  %v62_v14 = vld [vmem:[#allocation6 + $0x48] sm:$0xff]  ;;  %p322_p2 = scmp.ne.s32.totalorder %s174_s12, %s321_s13  ;;  %p327_p4 = scmp.lt.s32.totalorder %s321_s13, %s321_s13 }
  0x2a   :  { %243 = vmatpush3.bf16.xpose.msra.mxu0 %v240_v3  ;;  %v252_v12 = vpack.c.bf16 %v60_v11, %v59_v10  ;;  %v256_v15 = vpack.c.bf16 %v62_v14, %v61_v13  ;;  %v63_v16 = vld [vmem:[#allocation6 + $0x50] sm:$0xff]  ;;  %v64_v17 = vld [vmem:[#allocation6 + $0x58] sm:$0xff]  ;;  %v65_v19 = vld [vmem:[#allocation6 + $0x60] sm:$0xff] }
  0x2b   :  { %245 = vmatprep.subr.bf16.mxu0 %v244_v5  ;;  %v260_v18 = vpack.c.bf16 %v64_v17, %v63_v16  ;;  %v66_v20 = vld [vmem:[#allocation6 + $0x68] sm:$0xff]  ;;  %v67_v22 = vld [vmem:[#allocation6 + $0x70] sm:$0xff]  ;;  %v68_v23 = vld [vmem:[#allocation6 + $0x78] sm:$0xff]  ;;  %p328_p5 = por %p327_p4, %p326_p3 }
  0x2c   :  { %v264_v21 = vpack.c.bf16 %v66_v20, %v65_v19  ;;  %v268_v24 = vpack.c.bf16 %v68_v23, %v67_v22  ;;  %v52_v25 = vld [vmem:[#allocation3 + $0x8] sm:$0xff]  ;;  %v186_v26 = vld [vmem:[%s424_s2] ss:$0 sm:$0xff] }
  0x2d   :  { %p329_p6 = pnand %p328_p5, %p322_p2 }
  0x32   :  { %247 = vmatpush3.bf16.xpose.msra.mxu0 %v244_v5 }
  0x33   :  { %249 = vmatprep.subr.bf16.mxu0 %v248_v9 }
  0x3a   :  { %251 = vmatpush3.bf16.xpose.msra.mxu0 %v248_v9 }
  0x3b   :  { %253 = vmatprep.subr.bf16.mxu0 %v252_v12 }
  0x42   :  { %255 = vmatpush3.bf16.xpose.msra.mxu0 %v252_v12 }
  0x43   :  { %257 = vmatprep.subr.bf16.mxu0 %v256_v15 }
  0x4a   :  { %259 = vmatpush3.bf16.xpose.msra.mxu0 %v256_v15 }
  0x4b   :  { %261 = vmatprep.subr.bf16.mxu0 %v260_v18 }
  0x52   :  { %263 = vmatpush3.bf16.xpose.msra.mxu0 %v260_v18 }
  0x53   :  { %265 = vmatprep.subr.bf16.mxu0 %v264_v21 }
  0x5a   :  { %267 = vmatpush3.bf16.xpose.msra.mxu0 %v264_v21 }
  0x5b   :  { %269 = vmatprep.subr.bf16.mxu0 %v268_v24 }
  0x62   :  { %271 = vmatpush3.bf16.xpose.msra.mxu0 %v268_v24 }
  0x69   :  { %238 = vmatmul.mubr.f32.vlgmr.msra.gmra.mrb[0].mxu0 %v52_v25 }
 0x13c   :  { %v239_v27 = vpop.f32.mrb[0].mxu0 }
 0x13d   :  { %v161_v28 = vadd.f32 %v239_v27, %v186_v26  ;;  %v135_v29 = vpop.f32.mrb[1].mxu0 }
 0x13e   :  { %v160_v30 = vadd.f32 %v186_v26, %v135_v29 }
 0x13f   :  { %v163_v31 = vmul.f32 0.1, %v161_v28 }
 0x140   :  { %v162_v32 = vmul.f32 0.1, %v160_v30 }
 0x141   :  { %v165_v33 = vmax.f32 %v161_v28, %v163_v31 }
 0x142   :  { %v164_v34 = vmax.f32 %v160_v30, %v162_v32 }
 0x143   :  { %167 = vst [vmem:[#allocation8 + $0x8] sm:$0xff] %v165_v33 }
 0x144   :  { %166 = vst [vmem:[#allocation8] sm:$0xff] %v164_v34 }
 0x145   :  { %332 = shalt.err (!%p329_p6)
}
 0x146   :  { %s333_s15 = scalar_lea.hbm %s425_s3, 256 }
 0x147   :  { %p334_p7 = scmp.ne.s32.totalorder %s425_s3, %s333_s15  ;;  %p337_p8 = scmp.lt.u32.totalorder %s333_s15, %s425_s3 }
 0x149   :  { %p339_p9 = pnand %p337_p8, %p334_p7 }
 0x14b   :  { %342 = shalt.err (!%p339_p9)
}
 0x14c   :  { %179 = dma.vmem_to_hbm [thread:$0]  %s174_s12, 256, %s425_s3, [#allocation5], %s350_s22, %s350_s22, %s351_s23  }
 0x14d   :  { %347 = dma.done.wait [#allocation5], 256  }
 0x14e   :  { %348 = vsyncadd [#allocation5], 4294967040 }
 0x14f   :  { %183 = vsyncpa [#allocation4], 1 }
 0x150   :  { %184 = vsyncpa [#allocation7], 1 }
 0x151   :  { %185 = vsyncpa [#allocation5], 1 }

</bundles_post_ra>
